<compile_context>
chip_gen: v6e
topology: v6e:2x2x1
jax: 0.10.0
libtpu: 0.0.40
codegen_flags: <defaults>
</compile_context>

<pallas_src>
import jax
import jax.numpy as jnp
from jax.experimental import pallas as pl
from jax.experimental.pallas import tpu as pltpu

_LANE = 128
_SUBLANE = 8


def _round_up(v, m):
    return ((v + m - 1) // m) * m


def _cdiv(a, b):
    return (a + b - 1) // b


# --------------------------------------------------------------------------
# Kernel: one batch tile per grid step; both matmuls fused so the hidden
# activation never touches HBM.
# --------------------------------------------------------------------------
def two_layer_kernel(x_ref, w1_ref, b1_ref, w2_ref, b2_ref, o_ref):
    # x tile: (TM, D_in) bf16 ; w1/w2 bf16 ; b1/b2 f32 ; output f32 (or bf16).
    x = x_ref[...]
    h = jnp.dot(x, w1_ref[...], preferred_element_type=jnp.float32) + b1_ref[...]
    # Fused relu + bf16 cast feeding the second dot (small live range for h).
    h_bf = jnp.maximum(h, 0.0).astype(w2_ref.dtype)
    y = jnp.dot(h_bf, w2_ref[...], preferred_element_type=jnp.float32) + b2_ref[...]
    o_ref[...] = y.astype(o_ref.dtype)


# --------------------------------------------------------------------------
# One-time parameter preparation (pad lane dims to 128, cast to bf16).
# Call once; reuse the returned pytree for every forward call.
# --------------------------------------------------------------------------
def prepare_params(w1, b1, w2, b2):
    """w1:(D_in,H)  b1:(H,) or (1,H)  w2:(H,D_out)  b2:(D_out,) or (1,D_out).

    Weights are stored transposed relative to torch.nn.Linear so the kernel
    computes x @ W1 + b1 and h @ W2 + b2 directly on the MXU.
    """
    D_in, H = w1.shape
    D_out = w2.shape[1]
    H_p = _round_up(H, _LANE)
    D_out_p = _round_up(D_out, _LANE)

    b1 = jnp.asarray(b1, jnp.float32).reshape(1, H)
    b2 = jnp.asarray(b2, jnp.float32).reshape(1, D_out)

    # Streamed-on-MXU operands -> bf16; biases stay f32 (added to f32 acc).
    w1_p = jnp.zeros((D_in, H_p), jnp.bfloat16).at[:, :H].set(w1.astype(jnp.bfloat16))
    b1_p = jnp.zeros((1, H_p), jnp.float32).at[:, :H].set(b1)
    w2_p = jnp.zeros((H_p, D_out_p), jnp.bfloat16).at[:H, :D_out].set(
        w2.astype(jnp.bfloat16))
    b2_p = jnp.zeros((1, D_out_p), jnp.float32).at[:, :D_out].set(b2)

    return {"w1": w1_p, "b1": b1_p, "w2": w2_p, "b2": b2_p, "D_out": D_out}


# --------------------------------------------------------------------------
# Forward wrapper.
# --------------------------------------------------------------------------
def two_layer_net(x, params, *, tm=512, out_dtype=jnp.float32):
    """x: (N, D_in) f32.  Returns (N, D_out) in `out_dtype` (default f32)."""
    N, D_in = x.shape
    w1_p, b1_p, w2_p, b2_p = params["w1"], params["b1"], params["w2"], params["b2"]
    D_out = params["D_out"]
    assert w1_p.shape[0] == D_in, "x feature dim must match prepared w1"
    H_p = w1_p.shape[1]
    D_out_p = w2_p.shape[1]

    # Only remaining per-call transform: cast the streamed operand to bf16
    # (halves x's HBM bytes).  No padding copies of x at all.
    x_bf = x.astype(jnp.bfloat16)

    # ---- TM sizing: aim for >= ~8 grid steps when N is large (dual-TC on
    # v7x + DMA pipelining), capped by `tm`, at least one sublane group. ----
    TM = max(_SUBLANE, min(tm, _round_up(_cdiv(N, 8), _SUBLANE)))

    # ---- Generation-aware VMEM budget; shrink TM if the footprint is too
    # big.  Resident weights are single-buffered (pl.Buffered(1)). ----
    try:
        vmem_cap = pltpu.get_tpu_info().vmem_capacity_bytes
    except Exception:
        vmem_cap = 64 * 1024 * 1024  # conservative (v7x per-TC)
    vmem_budget = (vmem_cap * 3) // 4  # ~96 MiB on v5e/v6e, ~48 MiB on v7x

    out_bytes = jnp.dtype(out_dtype).itemsize
    resident = (w1_p.size + w2_p.size) * 2 + (b1_p.size + b2_p.size) * 4

    def _footprint(tm_):
        streamed = 2 * tm_ * D_in * 2 + 2 * tm_ * D_out_p * out_bytes  # dbl-buf
        live = tm_ * H_p * (4 + 2)  # f32 hidden + bf16 copy feeding 2nd dot
        return resident + streamed + live

    while TM > _SUBLANE and _footprint(TM) > vmem_budget:
        TM = max(_SUBLANE, _round_up(TM // 2, _SUBLANE))
    # NOTE: if the resident weights alone ever exceed the budget (huge H),
    # the right fix is a K-tiled grid axis ('arbitrary') with an f32 VMEM
    # accumulator instead of fully-resident weights.

    grid = (_cdiv(N, TM),)  # partial last block handled by Pallas clipping

    cost = pl.CostEstimate(
        flops=2 * N * (D_in * H_p + H_p * D_out_p),
        transcendentals=0,
        bytes_accessed=(x_bf.size * 2 + w1_p.size * 2 + w2_p.size * 2
                        + b1_p.size * 4 + b2_p.size * 4
                        + N * D_out_p * out_bytes),
    )

    resident_buf = pl.Buffered(1)  # constant index_map -> one buffer suffices

    out = pl.pallas_call(
        two_layer_kernel,
        out_shape=jax.ShapeDtypeStruct((N, D_out_p), out_dtype),
        grid=grid,
        in_specs=[
            # streamed x tile (double-buffered by default)
            pl.BlockSpec((TM, D_in), lambda i: (i, 0)),
            # VMEM-resident, single-buffered weights/biases
            pl.BlockSpec((D_in, H_p), lambda i: (0, 0), pipeline_mode=resident_buf),
            pl.BlockSpec((1, H_p), lambda i: (0, 0), pipeline_mode=resident_buf),
            pl.BlockSpec((H_p, D_out_p), lambda i: (0, 0), pipeline_mode=resident_buf),
            pl.BlockSpec((1, D_out_p), lambda i: (0, 0), pipeline_mode=resident_buf),
        ],
        out_specs=pl.BlockSpec((TM, D_out_p), lambda i: (i, 0)),
        compiler_params=pltpu.CompilerParams(
            dimension_semantics=("parallel",),  # dual-TC sharding on v7x
            vmem_limit_bytes=int(vmem_budget),
        ),
        cost_estimate=cost,
    )(x_bf, w1_p, b1_p, w2_p, b2_p)

    return out[:, :D_out]


def init_params(key, D_in, H, D_out):
    """Deterministic init mirroring torch.nn.Linear's U(-1/sqrt(fan_in), +)."""
    k1, k2, k3, k4 = jax.random.split(key, 4)
    bound1 = 1.0 / jnp.sqrt(D_in)
    bound2 = 1.0 / jnp.sqrt(H)
    w1 = jax.random.uniform(k1, (D_in, H), jnp.float32, -bound1, bound1)
    b1 = jax.random.uniform(k2, (1, H), jnp.float32, -bound1, bound1)
    w2 = jax.random.uniform(k3, (H, D_out), jnp.float32, -bound2, bound2)
    b2 = jax.random.uniform(k4, (1, D_out), jnp.float32, -bound2, bound2)
    return w1, b1, w2, b2


if __name__ == "__main__":
    # Small shapes consistent with the module: N x D_in -> H -> D_out
    N, D_in, H, D_out = 8, 64, 128, 32

    key = jax.random.PRNGKey(0)
    kx, kp = jax.random.split(key)
    x = jax.random.normal(kx, (N, D_in), jnp.float32)
    w1, b1, w2, b2 = init_params(kp, D_in, H, D_out)

    # Pad + cast the weights ONCE; reuse for every forward call.
    params = prepare_params(w1, b1, w2, b2)

    y = two_layer_net(x, params)
    jax.block_until_ready(y)
    assert y.shape == (N, D_out)
    assert y.dtype == jnp.float32

    # Reference 1: same bf16-input / f32-accumulate recipe as the kernel.
    h_bf = jnp.maximum(
        jnp.dot(x.astype(jnp.bfloat16), w1.astype(jnp.bfloat16),
                preferred_element_type=jnp.float32) + b1, 0.0)
    y_bf = jnp.dot(h_bf.astype(jnp.bfloat16), w2.astype(jnp.bfloat16),
                   preferred_element_type=jnp.float32) + b2
    assert jnp.allclose(y, y_bf, atol=2e-3, rtol=2e-3)

    # Reference 2: pure f32 forward (module semantics), loose tol for bf16 IO.
    y_ref = jnp.maximum(x @ w1 + b1, 0.0) @ w2 + b2
    assert jnp.allclose(y, y_ref, atol=5e-2, rtol=5e-2)

    print("KERNEL_OK")
</pallas_src>

<mosaic_0001>
module attributes {stable_mosaic.version = 11 : i64} {
  func.func @two_layer_kernel(%arg0: i32, %arg1: memref<8x64xbf16, #tpu.memory_space<vmem>>, %arg2: memref<64x128xbf16, #tpu.memory_space<vmem>>, %arg3: memref<1x128xf32, #tpu.memory_space<vmem>>, %arg4: memref<128x128xbf16, #tpu.memory_space<vmem>>, %arg5: memref<1x128xf32, #tpu.memory_space<vmem>>, %arg6: memref<8x128xf32, #tpu.memory_space<vmem>>) attributes {dimension_semantics = [#tpu.dimension_semantics<parallel>], iteration_bounds = array<i64: 1>, scalar_prefetch = 0 : i64, scratch_operands = 0 : i64, tpu.core_type = #tpu.core_type<tc>, window_params = [{transform_indices = @transform_0, window_bounds = array<i64: 8, 64>}, {pipeline_mode = #tpu.pipeline_mode<synchronous>, transform_indices = @transform_1, window_bounds = array<i64: 64, 128>}, {pipeline_mode = #tpu.pipeline_mode<synchronous>, transform_indices = @transform_2, window_bounds = array<i64: 1, 128>}, {pipeline_mode = #tpu.pipeline_mode<synchronous>, transform_indices = @transform_3, window_bounds = array<i64: 128, 128>}, {pipeline_mode = #tpu.pipeline_mode<synchronous>, transform_indices = @transform_4, window_bounds = array<i64: 1, 128>}, {transform_indices = @transform_5, window_bounds = array<i64: 8, 128>}]} {
    %c0 = arith.constant 0 : index
    %c0_0 = arith.constant 0 : index
    %0 = vector.load %arg1[%c0, %c0_0] : memref<8x64xbf16, #tpu.memory_space<vmem>>, vector<8x64xbf16>
    %c0_1 = arith.constant 0 : index
    %c0_2 = arith.constant 0 : index
    %1 = vector.load %arg2[%c0_1, %c0_2] : memref<64x128xbf16, #tpu.memory_space<vmem>>, vector<64x128xbf16>
    %cst = arith.constant dense<0.000000e+00> : vector<8x128xf32>
    %2 = tpu.matmul %0, %1, %cst {dimension_numbers = #tpu.dot_dimension_numbers<[1], [0], [0], [1], [0, 0, 1, 1], [], []>} : vector<8x64xbf16>, vector<64x128xbf16>, vector<8x128xf32> -> vector<8x128xf32>
    %c0_3 = arith.constant 0 : index
    %c0_4 = arith.constant 0 : index
    %3 = vector.load %arg3[%c0_3, %c0_4] : memref<1x128xf32, #tpu.memory_space<vmem>>, vector<1x128xf32>
    %4 = vector.broadcast %3 : vector<1x128xf32> to vector<8x128xf32>
    %5 = arith.addf %2, %4 : vector<8x128xf32>
    %cst_5 = arith.constant 0.000000e+00 : f32
    %6 = vector.broadcast %cst_5 : f32 to vector<8x128xf32>
    %7 = arith.maximumf %5, %6 : vector<8x128xf32>
    %8 = arith.truncf %7 : vector<8x128xf32> to vector<8x128xbf16>
    %c0_6 = arith.constant 0 : index
    %c0_7 = arith.constant 0 : index
    %9 = vector.load %arg4[%c0_6, %c0_7] : memref<128x128xbf16, #tpu.memory_space<vmem>>, vector<128x128xbf16>
    %cst_8 = arith.constant dense<0.000000e+00> : vector<8x128xf32>
    %10 = tpu.matmul %8, %9, %cst_8 {dimension_numbers = #tpu.dot_dimension_numbers<[1], [0], [0], [1], [0, 0, 1, 1], [], []>} : vector<8x128xbf16>, vector<128x128xbf16>, vector<8x128xf32> -> vector<8x128xf32>
    %c0_9 = arith.constant 0 : index
    %c0_10 = arith.constant 0 : index
    %11 = vector.load %arg5[%c0_9, %c0_10] : memref<1x128xf32, #tpu.memory_space<vmem>>, vector<1x128xf32>
    %12 = vector.broadcast %11 : vector<1x128xf32> to vector<8x128xf32>
    %13 = arith.addf %10, %12 : vector<8x128xf32>
    %c0_11 = arith.constant 0 : index
    %c0_12 = arith.constant 0 : index
    %14 = vector.load %arg6[%c0_11, %c0_12] : memref<8x128xf32, #tpu.memory_space<vmem>>, vector<8x128xf32>
    tpu.vector_store %arg6[%c0_11, %c0_12], %13 {strides = array<i32>} : memref<8x128xf32, #tpu.memory_space<vmem>>, vector<8x128xf32>,
    return
  }
  func.func @transform_0(%arg0: i32) -> (i32, i32) {
    %c0_i32 = arith.constant 0 : i32
    %c0_i32_0 = arith.constant 0 : i32
    return %arg0, %c0_i32 : i32, i32
  }
  func.func @transform_1(%arg0: i32) -> (i32, i32) {
    %c0_i32 = arith.constant 0 : i32
    %c0_i32_0 = arith.constant 0 : i32
    %c0_i32_1 = arith.constant 0 : i32
    return %c0_i32, %c0_i32_0 : i32, i32
  }
  func.func @transform_2(%arg0: i32) -> (i32, i32) {
    %c0_i32 = arith.constant 0 : i32
    %c0_i32_0 = arith.constant 0 : i32
    %c0_i32_1 = arith.constant 0 : i32
    return %c0_i32, %c0_i32_0 : i32, i32
  }
  func.func @transform_3(%arg0: i32) -> (i32, i32) {
    %c0_i32 = arith.constant 0 : i32
    %c0_i32_0 = arith.constant 0 : i32
    %c0_i32_1 = arith.constant 0 : i32
    return %c0_i32, %c0_i32_0 : i32, i32
  }
  func.func @transform_4(%arg0: i32) -> (i32, i32) {
    %c0_i32 = arith.constant 0 : i32
    %c0_i32_0 = arith.constant 0 : i32
    %c0_i32_1 = arith.constant 0 : i32
    return %c0_i32, %c0_i32_0 : i32, i32
  }
  func.func @transform_5(%arg0: i32) -> (i32, i32) {
    %c0_i32 = arith.constant 0 : i32
    %c0_i32_0 = arith.constant 0 : i32
    return %arg0, %c0_i32 : i32, i32
  }
}

</mosaic_0001>

<bundles_post_ra>
// kernel: tpu_custom_call.1
= control target key start
LH: loop header
LB: loop body
LE: loop exit
PB: predicated region body
PF: predicated region fallthrough
CT: control target
= control target key end

     0   :  { %10 = vsyncpa [#allocation3], 0  ;;  %s498_s0 = inlined_call_operand.hbm [shape: bf16[8,64], index: 0, kind: input, shape index: {}]   ;;  %s499_s1 = inlined_call_operand.hbm [shape: bf16[64,128], index: 1, kind: input, shape index: {}]   ;;  %s500_s2 = inlined_call_operand.vmem [shape: f32[1,128], index: 2, kind: input, shape index: {}]   ;;  %s501_s3 = inlined_call_operand.hbm [shape: bf16[128,128], index: 3, kind: input, shape index: {}]   ;;  %s502_s4 = inlined_call_operand.vmem [shape: f32[1,128], index: 4, kind: input, shape index: {}]   ;;  %s503_s5 = inlined_call_operand.hbm [shape: f32[8,128], index: 5, kind: output, shape index: {}]  }
   0x1   :  { %11 = vsyncpa [#allocation6], 0 }
   0x2   :  { %12 = vsyncpa [#allocation4], 0  ;;  %s442_s18 = smov [#allocation5]  }
   0x3   :  { %s28_s19 = sshll.u32 %s442_s18, 4  ;;  %s29_s19 = int_to_ptr.vmem [resolvable:$true] %s28_s19 }
   0x4   :  { %s364_s20 = scalar_lea.vmem %s29_s19, 512  ;;  %p369_p1 = scmp.lt.s32.totalorder %s29_s19, %s29_s19 }
   0x5   :  { %p365_p0 = scmp.ne.s32.totalorder %s29_s19, %s364_s20  ;;  %p370_p2 = scmp.lt.s32.totalorder %s364_s20, %s364_s20 }
   0x7   :  { %p371_p3 = por %p370_p2, %p369_p1 }
   0x9   :  { %p372_p4 = pnand %p371_p3, %p365_p0 }
   0xb   :  { %375 = shalt.err (!%p372_p4)
}
   0xc   :  { %s443_s21 = smov 64   ;;  %s444_s22 = smov 4  }
   0xd   :  { %34 = dma.hbm_to_vmem [thread:$0]  %s499_s1, 512, %s29_s19, [#allocation6], %s443_s21, %s443_s21, %s444_s22  }
   0xe   :  { %s445_s25 = smov [#allocation2]   ;;  %s446_s27 = smov [#allocation7]  }
   0xf   :  { %s19_s26 = sshll.u32 %s445_s25, 4  ;;  %s42_s28 = sshll.u32 %s446_s27, 4  ;;  %s20_s26 = int_to_ptr.vmem [resolvable:$true] %s19_s26  ;;  %s43_s28 = int_to_ptr.vmem [resolvable:$true] %s42_s28 }
  0x10   :  { %s384_s29 = scalar_lea.vmem %s20_s26, 64  ;;  %p389_p6 = scmp.lt.s32.totalorder %s20_s26, %s20_s26 }
  0x11   :  { %p385_p5 = scmp.ne.s32.totalorder %s20_s26, %s384_s29  ;;  %p390_p7 = scmp.lt.s32.totalorder %s384_s29, %s384_s29 }
  0x13   :  { %p391_p8 = por %p390_p7, %p389_p6 }
  0x15   :  { %p392_p9 = pnand %p391_p8, %p385_p5 }
  0x17   :  { %395 = shalt.err (!%p392_p9)
}
  0x18   :  { %22 = dma.hbm_to_vmem [thread:$0]  %s498_s0, 64, %s20_s26, [#allocation3]  }
  0x19   :  { %s404_s7 = scalar_lea.vmem %s43_s28, 1024  ;;  %p409_p11 = scmp.lt.s32.totalorder %s43_s28, %s43_s28 }
  0x1a   :  { %p405_p10 = scmp.ne.s32.totalorder %s43_s28, %s404_s7  ;;  %p410_p12 = scmp.lt.s32.totalorder %s404_s7, %s404_s7 }
  0x1c   :  { %p411_p13 = por %p410_p12, %p409_p11 }
  0x1e   :  { %p412_p0 = pnand %p411_p13, %p405_p10 }
  0x20   :  { %415 = shalt.err (!%p412_p0)
}
  0x21   :  { %48 = dma.hbm_to_vmem [thread:$0]  %s501_s3, 1024, %s43_s28, [#allocation6], %s443_s21, %s443_s21, %s444_s22  }
  0x22   :  { %436 = dma.done.wait [#allocation3], 64  }
  0x23   :  { %437 = vsyncadd [#allocation3], 4294967232 }
  0x24   :  { %438 = dma.done.wait [#allocation6], 1536  }
  0x25   :  { %439 = vsyncadd [#allocation6], 4294965760  ;;  %v447_v0 = vmov 0.0   ;;  %vm448_vm0 = vmmov 0   ;;  %v344_v1 = vld [vmem:[#allocation5 + $0x18] sm:$0xff]   ;;  %v345_v2 = vld [vmem:[#allocation5 + $0x10] sm:$0xff]  }
  0x26   :  { %304 = vmatprep.subr.bf16.mxu0 %v447_v0  ;;  %312 = vmatprep.mubr.msk.bf16.mxu0 %vm448_vm0, %v447_v0  ;;  %v348_v3 = vld [vmem:[#allocation7 + $0x38] sm:$0xff]   ;;  %v346_v4 = vld [vmem:[#allocation5 + $0x8] sm:$0xff]   ;;  %v349_v5 = vld [vmem:[#allocation7 + $0x30] sm:$0xff]   ;;  %vm101_vm1 = vcmask 523264   ;;  %s449_s11 = smov [#allocation8]  }
  0x27   :  { %316 = vmatprep.subr.bf16.mxu1 %v447_v0  ;;  %332 = vmatprep.mubr.msk.bf16.mxu1 %vm448_vm0, %v447_v0  ;;  %v347_v6 = vld [vmem:[#allocation5] sm:$0xff]   ;;  %v350_v7 = vld [vmem:[#allocation7 + $0x28] sm:$0xff]   ;;  %v61_v8 = vld [vmem:[#allocation2] sm:$0xf]  ;;  %s265_s12 = sshll.u32 %s449_s11, 4  ;;  %s266_s12 = int_to_ptr.vmem [resolvable:$true] %s265_s12 }
  0x28   :  { %305 = vmatpush3.bf16.msra.mxu0 %v344_v1  ;;  %317 = vmatpush3.bf16.msra.mxu1 %v348_v3  ;;  %v351_v9 = vld [vmem:[#allocation7 + $0x20] sm:$0xff]   ;;  %v352_v10 = vld [vmem:[#allocation7 + $0x18] sm:$0xff]   ;;  %v353_v11 = vld [vmem:[#allocation7 + $0x10] sm:$0xff]   ;;  %p421_p2 = scmp.lt.s32.totalorder %s266_s12, %s266_s12 }
  0x29   :  { %306 = vmatprep.subr.bf16.mxu0 %v447_v0  ;;  %318 = vmatprep.subr.bf16.mxu1 %v447_v0  ;;  %v354_v12 = vld [vmem:[#allocation7 + $0x8] sm:$0xff]   ;;  %v355_v13 = vld [vmem:[#allocation7] sm:$0xff]   ;;  %v275_v14 = vld [vmem:[%s500_s2] ss:$0 sm:$0xff]  ;;  %s416_s2 = scalar_lea.vmem %s266_s12, 128 }
  0x2a   :  { %v281_v22 = vld [vmem:[%s502_s4] ss:$0 sm:$0xff]  ;;  %p417_p1 = scmp.ne.s32.totalorder %s266_s12, %s416_s2  ;;  %p422_p3 = scmp.lt.s32.totalorder %s416_s2, %s416_s2 }
  0x2c   :  { %307 = vmatpush3.bf16.msra.mxu0 %v345_v2  ;;  %319 = vmatpush3.bf16.msra.mxu1 %v349_v5  ;;  %p423_p4 = por %p422_p3, %p421_p2 }
  0x2d   :  { %308 = vmatprep.subr.bf16.mxu0 %v447_v0  ;;  %320 = vmatprep.subr.bf16.mxu1 %v447_v0 }
  0x2e   :  { %p424_p5 = pnand %p423_p4, %p417_p1 }
  0x30   :  { %309 = vmatpush3.bf16.msra.mxu0 %v346_v4  ;;  %321 = vmatpush3.bf16.msra.mxu1 %v350_v7 }
  0x31   :  { %310 = vmatprep.subr.bf16.mxu0 %v447_v0  ;;  %322 = vmatprep.subr.bf16.mxu1 %v447_v0 }
  0x34   :  { %311 = vmatpush3.bf16.msra.mxu0 %v347_v6  ;;  %323 = vmatpush3.bf16.msra.mxu1 %v351_v9 }
  0x35   :  { %324 = vmatprep.subr.bf16.mxu1 %v447_v0 }
  0x37   :  { %313 = vmatmul.mubr.msk.bf16.vlgmr.msra.gmra.mxu0 %vm101_vm1, %v61_v8 }
  0x38   :  { %325 = vmatpush3.bf16.msra.mxu1 %v352_v10 }
  0x39   :  { %326 = vmatprep.subr.bf16.mxu1 %v447_v0 }
  0x3c   :  { %327 = vmatpush3.bf16.msra.mxu1 %v353_v11 }
  0x3d   :  { %328 = vmatprep.subr.bf16.mxu1 %v447_v0 }
  0x40   :  { %329 = vmatpush3.bf16.msra.mxu1 %v354_v12 }
  0x41   :  { %330 = vmatprep.subr.bf16.mxu1 %v447_v0 }
  0x44   :  { %331 = vmatpush3.bf16.msra.mxu1 %v355_v13 }
  0xf7   :  { %v139_v15 = vpop.f32.mrf.mxu0 }
  0xf8   :  { %v140_v16 = vadd.f32 %v275_v14, %v139_v15 }
  0xf9   :  { %v314_v17 = vpop.f32.mrf.mxu0 }
  0xfa   :  { %v145_v18 = vmax.f32 %v140_v16, 0.0 }
  0xfb   :  { %v142_v19 = vpop.f32.mrf.mxu0 }
  0xfc   :  { %v146_v20 = vpack.c.bf16 %v145_v18, %v145_v18 }
  0xfd   :  { %v315_v21 = vpop.f32.mrf.mxu0 }
  0xfe   :  { %333 = vmatmul.mubr.bf16.vlgmr.msra.gmra.mxu1 %v146_v20 }
 0x1be   :  { %v252_v23 = vpop.f32.mrf.mxu1 }
 0x1bf   :  { %v253_v24 = vadd.f32 %v281_v22, %v252_v23 }
 0x1c0   :  { %v334_v25 = vpop.f32.mrf.mxu1 }
 0x1c1   :  { %258 = vst [vmem:[#allocation8] sm:$0xff] %v253_v24 }
 0x1c2   :  { %v255_v26 = vpop.f32.mrf.mxu1 }
 0x1c3   :  { %427 = shalt.err (!%p424_p5)
}
 0x1c4   :  { %268 = dma.vmem_to_hbm [thread:$0]  %s266_s12, 128, %s503_s5, [#allocation4]   ;;  %v335_v27 = vpop.f32.mrf.mxu1 }
 0x1c5   :  { %440 = dma.done.wait [#allocation4], 128  }
 0x1c6   :  { %441 = vsyncadd [#allocation4], 4294967168 }
 0x1c7   :  { %272 = vsyncpa [#allocation3], 1 }
 0x1c8   :  { %273 = vsyncpa [#allocation6], 1 }
 0x1c9   :  { %274 = vsyncpa [#allocation4], 1 }

</bundles_post_ra>
